<compile_context>
chip_gen: v7x
topology: tpu7x:2x2x1
jax: 0.10.0
libtpu: 0.0.40
codegen_flags: <defaults>
</compile_context>

<pallas_src>
import math

import jax
import jax.numpy as jnp
from jax.experimental import pallas as pl
from jax.experimental.pallas import tpu as pltpu

SEQ_LEN = 8
INPUT_SIZE = 10
HIDDEN_SIZE = 32
OUTPUT_SIZE = 10

# Weight-slab row offsets (aligned to the bf16 (16, 128) sublane tile).
W_IH_ROW = 0
W_HH_ROW = 16
W_LIN_ROW = 48
W_SLAB_ROWS = 80


def lstm_kernel(x_ref, w_ref, b_ref, out_ref, xg_ref):
    """Single-program kernel: whole problem resident in VMEM (~25 KB).

    x_ref   : (seq, input)      f32
    w_ref   : (80, 4H)          bf16  packed [W_ih^T | W_hh^T | W_lin^T]
    b_ref   : (2, 4H)           f32   row0 = gate bias (pre-scaled), row1 = lin bias
    out_ref : (1, out)          f32   -> predictions[-1]
    xg_ref  : (seq, 4H)         f32   VMEM scratch (input projections)
    """
    H = HIDDEN_SIZE
    seq = x_ref.shape[0]

    x = x_ref[...].astype(jnp.bfloat16)                       # (seq, input)
    wih = w_ref[W_IH_ROW:W_IH_ROW + INPUT_SIZE, :]            # (input, 4H) bf16
    whh = w_ref[W_HH_ROW:W_HH_ROW + H, :]                     # (H, 4H)     bf16

    # All input-to-gate projections in one MXU pass; pre-scaled bias in f32.
    xg_ref[...] = (
        jnp.dot(x, wih, preferred_element_type=jnp.float32) + b_ref[0:1, :]
    )

    h = jnp.zeros((1, H), jnp.float32)
    c = jnp.zeros((1, H), jnp.float32)

    # Statically unrolled recurrence (seq is a compile-time constant).
    for t in range(seq):
        # Recurrent matmul: (1, H) bf16 @ (H, 4H) bf16 -> (1, 4H) f32.
        gates = xg_ref[t:t + 1, :] + jnp.dot(
            h.astype(jnp.bfloat16), whh, preferred_element_type=jnp.float32
        )
        # Columns for i/f/o were pre-scaled by 0.5, so a single full-width tanh
        # yields both the sigmoid (0.5*tanh(x/2)+0.5) and the tanh activations.
        t_act = jnp.tanh(gates)
        sig = 0.5 * t_act + 0.5
        i = sig[:, 0 * H:1 * H]
        f = sig[:, 1 * H:2 * H]
        g = t_act[:, 2 * H:3 * H]
        o = sig[:, 3 * H:4 * H]
        c = f * c + i * g
        h = o * jnp.tanh(c)

    # Final linear layer; only the last time step's prediction is returned.
    wlin = w_ref[W_LIN_ROW:W_LIN_ROW + H, :]                  # (H, 4H) bf16
    out = jnp.dot(
        h.astype(jnp.bfloat16), wlin, preferred_element_type=jnp.float32
    ) + b_ref[1:2, :]
    out_ref[...] = out[:, :OUTPUT_SIZE]


def prepare_params(w_ih, w_hh, b_ih, b_hh, w_lin, b_lin):
    """One-time weight prep (transpose / scale-fold / cast / pack).

    w_ih  : (4H, input_size)   PyTorch weight_ih_l0
    w_hh  : (4H, H)            PyTorch weight_hh_l0
    b_ih  : (4H,)              PyTorch bias_ih_l0
    b_hh  : (4H,)              PyTorch bias_hh_l0
    w_lin : (out, H)           PyTorch linear.weight
    b_lin : (out,)             PyTorch linear.bias
    """
    H = HIDDEN_SIZE
    # Fold sigmoid(x) = 0.5*tanh(0.5*x)+0.5 into the weights: gate order is
    # [i, f, g, o]; the i/f/o columns get a 0.5 pre-scale, g stays unscaled.
    col_scale = jnp.concatenate([
        jnp.full((2 * H,), 0.5, jnp.float32),   # i, f
        jnp.ones((H,), jnp.float32),            # g
        jnp.full((H,), 0.5, jnp.float32),       # o
    ])

    wih_t = jnp.transpose(w_ih).astype(jnp.float32) * col_scale   # (input, 4H)
    whh_t = jnp.transpose(w_hh).astype(jnp.float32) * col_scale   # (H, 4H)
    b = (b_ih + b_hh).astype(jnp.float32) * col_scale             # (4H,)

    w_slab = jnp.zeros((W_SLAB_ROWS, 4 * H), jnp.bfloat16)
    w_slab = w_slab.at[W_IH_ROW:W_IH_ROW + INPUT_SIZE, :].set(
        wih_t.astype(jnp.bfloat16))
    w_slab = w_slab.at[W_HH_ROW:W_HH_ROW + H, :].set(
        whh_t.astype(jnp.bfloat16))
    w_slab = w_slab.at[W_LIN_ROW:W_LIN_ROW + H, 0:OUTPUT_SIZE].set(
        jnp.transpose(w_lin).astype(jnp.bfloat16))

    b_slab = jnp.zeros((2, 4 * H), jnp.float32)
    b_slab = b_slab.at[0, :].set(b)
    b_slab = b_slab.at[1, 0:OUTPUT_SIZE].set(b_lin.astype(jnp.float32))

    return w_slab, b_slab


@jax.jit
def lstm_forward(x, w_slab, b_slab):
    """Hot-path wrapper: just the pallas_call, everything VMEM-resident.

    Returns predictions[-1] of shape (out,).
    """
    vmem = pl.BlockSpec(memory_space=pltpu.MemorySpace.VMEM)
    out = pl.pallas_call(
        lstm_kernel,
        out_shape=jax.ShapeDtypeStruct((1, OUTPUT_SIZE), jnp.float32),
        in_specs=[vmem, vmem, vmem],
        out_specs=vmem,
        scratch_shapes=[pltpu.VMEM((SEQ_LEN, 4 * HIDDEN_SIZE), jnp.float32)],
    )(x.astype(jnp.float32), w_slab, b_slab)
    return out[0]


def lstm_reference(x, w_ih, w_hh, b_ih, b_hh, w_lin, b_lin):
    """Pure-JAX f32 reference mirroring torch.nn.LSTM + nn.Linear (batch=1)."""
    H = w_hh.shape[1]
    h = jnp.zeros((H,), jnp.float32)
    c = jnp.zeros((H,), jnp.float32)

    def step(carry, x_t):
        h, c = carry
        gates = w_ih @ x_t + b_ih + w_hh @ h + b_hh
        i = jax.nn.sigmoid(gates[0 * H:1 * H])
        f = jax.nn.sigmoid(gates[1 * H:2 * H])
        g = jnp.tanh(gates[2 * H:3 * H])
        o = jax.nn.sigmoid(gates[3 * H:4 * H])
        c_new = f * c + i * g
        h_new = o * jnp.tanh(c_new)
        return (h_new, c_new), h_new

    (h_last, _), _ = jax.lax.scan(step, (h, c), x)
    return w_lin @ h_last + b_lin


if __name__ == "__main__":
    key = jax.random.PRNGKey(0)
    keys = jax.random.split(key, 8)

    # Deterministic parameter init (PyTorch-style uniform(-k, k)).
    k_lstm = 1.0 / math.sqrt(HIDDEN_SIZE)
    k_lin = 1.0 / math.sqrt(HIDDEN_SIZE)

    w_ih = jax.random.uniform(keys[0], (4 * HIDDEN_SIZE, INPUT_SIZE),
                              jnp.float32, -k_lstm, k_lstm)
    w_hh = jax.random.uniform(keys[1], (4 * HIDDEN_SIZE, HIDDEN_SIZE),
                              jnp.float32, -k_lstm, k_lstm)
    b_ih = jax.random.uniform(keys[2], (4 * HIDDEN_SIZE,),
                              jnp.float32, -k_lstm, k_lstm)
    b_hh = jax.random.uniform(keys[3], (4 * HIDDEN_SIZE,),
                              jnp.float32, -k_lstm, k_lstm)
    w_lin = jax.random.uniform(keys[4], (OUTPUT_SIZE, HIDDEN_SIZE),
                               jnp.float32, -k_lin, k_lin)
    b_lin = jax.random.uniform(keys[5], (OUTPUT_SIZE,),
                               jnp.float32, -k_lin, k_lin)

    # Example input: input_seq of shape (seq_len, input_size), batch implicit = 1.
    x = jax.random.normal(keys[6], (SEQ_LEN, INPUT_SIZE), jnp.float32)

    # One-time weight prep (done once, reused across calls).
    params = prepare_params(w_ih, w_hh, b_ih, b_hh, w_lin, b_lin)
    params = jax.block_until_ready(params)

    pred = lstm_forward(x, *params)
    pred = jax.block_until_ready(pred)

    ref = lstm_reference(x, w_ih, w_hh, b_ih, b_hh, w_lin, b_lin)
    assert pred.shape == (OUTPUT_SIZE,)
    # bf16 weights -> tolerance relaxed vs. the f32 reference (per review).
    assert jnp.allclose(pred, ref, atol=2e-2, rtol=2e-2), (pred, ref)

    print("KERNEL_OK")
</pallas_src>

<mosaic_0001>
module attributes {stable_mosaic.version = 11 : i64} {
  func.func @lstm_kernel(%arg0: memref<8x10xf32, #tpu.memory_space<vmem>>, %arg1: memref<80x128xbf16, #tpu.memory_space<vmem>>, %arg2: memref<2x128xf32, #tpu.memory_space<vmem>>, %arg3: memref<1x10xf32, #tpu.memory_space<vmem>>, %arg4: memref<8x128xf32, #tpu.memory_space<vmem>>) attributes {dimension_semantics = [], scalar_prefetch = 0 : i64, scratch_operands = 1 : i64, tpu.core_type = #tpu.core_type<tc>} {
    %c0 = arith.constant 0 : index
    %c0_0 = arith.constant 0 : index
    %0 = vector.load %arg0[%c0, %c0_0] : memref<8x10xf32, #tpu.memory_space<vmem>>, vector<8x10xf32>
    %1 = arith.truncf %0 : vector<8x10xf32> to vector<8x10xbf16>
    %c0_1 = arith.constant 0 : index
    %c0_2 = arith.constant 0 : index
    %2 = vector.load %arg1[%c0_1, %c0_2] : memref<80x128xbf16, #tpu.memory_space<vmem>>, vector<10x128xbf16>
    %c16 = arith.constant 16 : index
    %c0_3 = arith.constant 0 : index
    %3 = vector.load %arg1[%c16, %c0_3] : memref<80x128xbf16, #tpu.memory_space<vmem>>, vector<32x128xbf16>
    %cst = arith.constant dense<0.000000e+00> : vector<8x128xf32>
    %4 = tpu.matmul %1, %2, %cst {dimension_numbers = #tpu.dot_dimension_numbers<[1], [0], [0], [1], [0, 0, 1, 1], [], []>} : vector<8x10xbf16>, vector<10x128xbf16>, vector<8x128xf32> -> vector<8x128xf32>
    %c0_4 = arith.constant 0 : index
    %c0_5 = arith.constant 0 : index
    %5 = vector.load %arg2[%c0_4, %c0_5] : memref<2x128xf32, #tpu.memory_space<vmem>>, vector<1x128xf32>
    %6 = vector.broadcast %5 : vector<1x128xf32> to vector<8x128xf32>
    %7 = arith.addf %4, %6 : vector<8x128xf32>
    %c0_6 = arith.constant 0 : index
    %c0_7 = arith.constant 0 : index
    %8 = vector.load %arg4[%c0_6, %c0_7] : memref<8x128xf32, #tpu.memory_space<vmem>>, vector<8x128xf32>
    tpu.vector_store %arg4[%c0_6, %c0_7], %7 {strides = array<i32>} : memref<8x128xf32, #tpu.memory_space<vmem>>, vector<8x128xf32>,
    %cst_8 = arith.constant 0.000000e+00 : f32
    %9 = vector.broadcast %cst_8 : f32 to vector<1x32xf32>
    %cst_9 = arith.constant 0.000000e+00 : f32
    %10 = vector.broadcast %cst_9 : f32 to vector<1x32xf32>
    %c0_10 = arith.constant 0 : index
    %c0_11 = arith.constant 0 : index
    %11 = vector.load %arg4[%c0_10, %c0_11] : memref<8x128xf32, #tpu.memory_space<vmem>>, vector<1x128xf32>
    %12 = arith.truncf %9 : vector<1x32xf32> to vector<1x32xbf16>
    %cst_12 = arith.constant dense<0.000000e+00> : vector<1x128xf32>
    %13 = tpu.matmul %12, %3, %cst_12 {dimension_numbers = #tpu.dot_dimension_numbers<[1], [0], [0], [1], [0, 0, 1, 1], [], []>} : vector<1x32xbf16>, vector<32x128xbf16>, vector<1x128xf32> -> vector<1x128xf32>
    %14 = arith.addf %11, %13 : vector<1x128xf32>
    %15 = math.tanh %14 : vector<1x128xf32>
    %cst_13 = arith.constant 5.000000e-01 : f32
    %16 = vector.broadcast %cst_13 : f32 to vector<1x128xf32>
    %17 = arith.mulf %16, %15 : vector<1x128xf32>
    %cst_14 = arith.constant 5.000000e-01 : f32
    %18 = vector.broadcast %cst_14 : f32 to vector<1x128xf32>
    %19 = arith.addf %17, %18 : vector<1x128xf32>
    %20 = vector.extract_strided_slice %19 {offsets = [0, 0], sizes = [1, 32], strides = [1, 1]} : vector<1x128xf32> to vector<1x32xf32>
    %21 = vector.extract_strided_slice %19 {offsets = [0, 32], sizes = [1, 32], strides = [1, 1]} : vector<1x128xf32> to vector<1x32xf32>
    %22 = vector.extract_strided_slice %15 {offsets = [0, 64], sizes = [1, 32], strides = [1, 1]} : vector<1x128xf32> to vector<1x32xf32>
    %23 = vector.extract_strided_slice %19 {offsets = [0, 96], sizes = [1, 32], strides = [1, 1]} : vector<1x128xf32> to vector<1x32xf32>
    %24 = arith.mulf %21, %10 : vector<1x32xf32>
    %25 = arith.mulf %20, %22 : vector<1x32xf32>
    %26 = arith.addf %24, %25 : vector<1x32xf32>
    %27 = math.tanh %26 : vector<1x32xf32>
    %28 = arith.mulf %23, %27 : vector<1x32xf32>
    %c1 = arith.constant 1 : index
    %c0_15 = arith.constant 0 : index
    %29 = vector.load %arg4[%c1, %c0_15] : memref<8x128xf32, #tpu.memory_space<vmem>>, vector<1x128xf32>
    %30 = arith.truncf %28 : vector<1x32xf32> to vector<1x32xbf16>
    %cst_16 = arith.constant dense<0.000000e+00> : vector<1x128xf32>
    %31 = tpu.matmul %30, %3, %cst_16 {dimension_numbers = #tpu.dot_dimension_numbers<[1], [0], [0], [1], [0, 0, 1, 1], [], []>} : vector<1x32xbf16>, vector<32x128xbf16>, vector<1x128xf32> -> vector<1x128xf32>
    %32 = arith.addf %29, %31 : vector<1x128xf32>
    %33 = math.tanh %32 : vector<1x128xf32>
    %cst_17 = arith.constant 5.000000e-01 : f32
    %34 = vector.broadcast %cst_17 : f32 to vector<1x128xf32>
    %35 = arith.mulf %34, %33 : vector<1x128xf32>
    %cst_18 = arith.constant 5.000000e-01 : f32
    %36 = vector.broadcast %cst_18 : f32 to vector<1x128xf32>
    %37 = arith.addf %35, %36 : vector<1x128xf32>
    %38 = vector.extract_strided_slice %37 {offsets = [0, 0], sizes = [1, 32], strides = [1, 1]} : vector<1x128xf32> to vector<1x32xf32>
    %39 = vector.extract_strided_slice %37 {offsets = [0, 32], sizes = [1, 32], strides = [1, 1]} : vector<1x128xf32> to vector<1x32xf32>
    %40 = vector.extract_strided_slice %33 {offsets = [0, 64], sizes = [1, 32], strides = [1, 1]} : vector<1x128xf32> to vector<1x32xf32>
    %41 = vector.extract_strided_slice %37 {offsets = [0, 96], sizes = [1, 32], strides = [1, 1]} : vector<1x128xf32> to vector<1x32xf32>
    %42 = arith.mulf %39, %26 : vector<1x32xf32>
    %43 = arith.mulf %38, %40 : vector<1x32xf32>
    %44 = arith.addf %42, %43 : vector<1x32xf32>
    %45 = math.tanh %44 : vector<1x32xf32>
    %46 = arith.mulf %41, %45 : vector<1x32xf32>
    %c2 = arith.constant 2 : index
    %c0_19 = arith.constant 0 : index
    %47 = vector.load %arg4[%c2, %c0_19] : memref<8x128xf32, #tpu.memory_space<vmem>>, vector<1x128xf32>
    %48 = arith.truncf %46 : vector<1x32xf32> to vector<1x32xbf16>
    %cst_20 = arith.constant dense<0.000000e+00> : vector<1x128xf32>
    %49 = tpu.matmul %48, %3, %cst_20 {dimension_numbers = #tpu.dot_dimension_numbers<[1], [0], [0], [1], [0, 0, 1, 1], [], []>} : vector<1x32xbf16>, vector<32x128xbf16>, vector<1x128xf32> -> vector<1x128xf32>
    %50 = arith.addf %47, %49 : vector<1x128xf32>
    %51 = math.tanh %50 : vector<1x128xf32>
    %cst_21 = arith.constant 5.000000e-01 : f32
    %52 = vector.broadcast %cst_21 : f32 to vector<1x128xf32>
    %53 = arith.mulf %52, %51 : vector<1x128xf32>
    %cst_22 = arith.constant 5.000000e-01 : f32
    %54 = vector.broadcast %cst_22 : f32 to vector<1x128xf32>
    %55 = arith.addf %53, %54 : vector<1x128xf32>
    %56 = vector.extract_strided_slice %55 {offsets = [0, 0], sizes = [1, 32], strides = [1, 1]} : vector<1x128xf32> to vector<1x32xf32>
    %57 = vector.extract_strided_slice %55 {offsets = [0, 32], sizes = [1, 32], strides = [1, 1]} : vector<1x128xf32> to vector<1x32xf32>
    %58 = vector.extract_strided_slice %51 {offsets = [0, 64], sizes = [1, 32], strides = [1, 1]} : vector<1x128xf32> to vector<1x32xf32>
    %59 = vector.extract_strided_slice %55 {offsets = [0, 96], sizes = [1, 32], strides = [1, 1]} : vector<1x128xf32> to vector<1x32xf32>
    %60 = arith.mulf %57, %44 : vector<1x32xf32>
    %61 = arith.mulf %56, %58 : vector<1x32xf32>
    %62 = arith.addf %60, %61 : vector<1x32xf32>
    %63 = math.tanh %62 : vector<1x32xf32>
    %64 = arith.mulf %59, %63 : vector<1x32xf32>
    %c3 = arith.constant 3 : index
    %c0_23 = arith.constant 0 : index
    %65 = vector.load %arg4[%c3, %c0_23] : memref<8x128xf32, #tpu.memory_space<vmem>>, vector<1x128xf32>
    %66 = arith.truncf %64 : vector<1x32xf32> to vector<1x32xbf16>
    %cst_24 = arith.constant dense<0.000000e+00> : vector<1x128xf32>
    %67 = tpu.matmul %66, %3, %cst_24 {dimension_numbers = #tpu.dot_dimension_numbers<[1], [0], [0], [1], [0, 0, 1, 1], [], []>} : vector<1x32xbf16>, vector<32x128xbf16>, vector<1x128xf32> -> vector<1x128xf32>
    %68 = arith.addf %65, %67 : vector<1x128xf32>
    %69 = math.tanh %68 : vector<1x128xf32>
    %cst_25 = arith.constant 5.000000e-01 : f32
    %70 = vector.broadcast %cst_25 : f32 to vector<1x128xf32>
    %71 = arith.mulf %70, %69 : vector<1x128xf32>
    %cst_26 = arith.constant 5.000000e-01 : f32
    %72 = vector.broadcast %cst_26 : f32 to vector<1x128xf32>
    %73 = arith.addf %71, %72 : vector<1x128xf32>
    %74 = vector.extract_strided_slice %73 {offsets = [0, 0], sizes = [1, 32], strides = [1, 1]} : vector<1x128xf32> to vector<1x32xf32>
    %75 = vector.extract_strided_slice %73 {offsets = [0, 32], sizes = [1, 32], strides = [1, 1]} : vector<1x128xf32> to vector<1x32xf32>
    %76 = vector.extract_strided_slice %69 {offsets = [0, 64], sizes = [1, 32], strides = [1, 1]} : vector<1x128xf32> to vector<1x32xf32>
    %77 = vector.extract_strided_slice %73 {offsets = [0, 96], sizes = [1, 32], strides = [1, 1]} : vector<1x128xf32> to vector<1x32xf32>
    %78 = arith.mulf %75, %62 : vector<1x32xf32>
    %79 = arith.mulf %74, %76 : vector<1x32xf32>
    %80 = arith.addf %78, %79 : vector<1x32xf32>
    %81 = math.tanh %80 : vector<1x32xf32>
    %82 = arith.mulf %77, %81 : vector<1x32xf32>
    %c4 = arith.constant 4 : index
    %c0_27 = arith.constant 0 : index
    %83 = vector.load %arg4[%c4, %c0_27] : memref<8x128xf32, #tpu.memory_space<vmem>>, vector<1x128xf32>
    %84 = arith.truncf %82 : vector<1x32xf32> to vector<1x32xbf16>
    %cst_28 = arith.constant dense<0.000000e+00> : vector<1x128xf32>
    %85 = tpu.matmul %84, %3, %cst_28 {dimension_numbers = #tpu.dot_dimension_numbers<[1], [0], [0], [1], [0, 0, 1, 1], [], []>} : vector<1x32xbf16>, vector<32x128xbf16>, vector<1x128xf32> -> vector<1x128xf32>
    %86 = arith.addf %83, %85 : vector<1x128xf32>
    %87 = math.tanh %86 : vector<1x128xf32>
    %cst_29 = arith.constant 5.000000e-01 : f32
    %88 = vector.broadcast %cst_29 : f32 to vector<1x128xf32>
    %89 = arith.mulf %88, %87 : vector<1x128xf32>
    %cst_30 = arith.constant 5.000000e-01 : f32
    %90 = vector.broadcast %cst_30 : f32 to vector<1x128xf32>
    %91 = arith.addf %89, %90 : vector<1x128xf32>
    %92 = vector.extract_strided_slice %91 {offsets = [0, 0], sizes = [1, 32], strides = [1, 1]} : vector<1x128xf32> to vector<1x32xf32>
    %93 = vector.extract_strided_slice %91 {offsets = [0, 32], sizes = [1, 32], strides = [1, 1]} : vector<1x128xf32> to vector<1x32xf32>
    %94 = vector.extract_strided_slice %87 {offsets = [0, 64], sizes = [1, 32], strides = [1, 1]} : vector<1x128xf32> to vector<1x32xf32>
    %95 = vector.extract_strided_slice %91 {offsets = [0, 96], sizes = [1, 32], strides = [1, 1]} : vector<1x128xf32> to vector<1x32xf32>
    %96 = arith.mulf %93, %80 : vector<1x32xf32>
    %97 = arith.mulf %92, %94 : vector<1x32xf32>
    %98 = arith.addf %96, %97 : vector<1x32xf32>
    %99 = math.tanh %98 : vector<1x32xf32>
    %100 = arith.mulf %95, %99 : vector<1x32xf32>
    %c5 = arith.constant 5 : index
    %c0_31 = arith.constant 0 : index
    %101 = vector.load %arg4[%c5, %c0_31] : memref<8x128xf32, #tpu.memory_space<vmem>>, vector<1x128xf32>
    %102 = arith.truncf %100 : vector<1x32xf32> to vector<1x32xbf16>
    %cst_32 = arith.constant dense<0.000000e+00> : vector<1x128xf32>
    %103 = tpu.matmul %102, %3, %cst_32 {dimension_numbers = #tpu.dot_dimension_numbers<[1], [0], [0], [1], [0, 0, 1, 1], [], []>} : vector<1x32xbf16>, vector<32x128xbf16>, vector<1x128xf32> -> vector<1x128xf32>
    %104 = arith.addf %101, %103 : vector<1x128xf32>
    %105 = math.tanh %104 : vector<1x128xf32>
    %cst_33 = arith.constant 5.000000e-01 : f32
    %106 = vector.broadcast %cst_33 : f32 to vector<1x128xf32>
    %107 = arith.mulf %106, %105 : vector<1x128xf32>
    %cst_34 = arith.constant 5.000000e-01 : f32
    %108 = vector.broadcast %cst_34 : f32 to vector<1x128xf32>
    %109 = arith.addf %107, %108 : vector<1x128xf32>
    %110 = vector.extract_strided_slice %109 {offsets = [0, 0], sizes = [1, 32], strides = [1, 1]} : vector<1x128xf32> to vector<1x32xf32>
    %111 = vector.extract_strided_slice %109 {offsets = [0, 32], sizes = [1, 32], strides = [1, 1]} : vector<1x128xf32> to vector<1x32xf32>
    %112 = vector.extract_strided_slice %105 {offsets = [0, 64], sizes = [1, 32], strides = [1, 1]} : vector<1x128xf32> to vector<1x32xf32>
    %113 = vector.extract_strided_slice %109 {offsets = [0, 96], sizes = [1, 32], strides = [1, 1]} : vector<1x128xf32> to vector<1x32xf32>
    %114 = arith.mulf %111, %98 : vector<1x32xf32>
    %115 = arith.mulf %110, %112 : vector<1x32xf32>
    %116 = arith.addf %114, %115 : vector<1x32xf32>
    %117 = math.tanh %116 : vector<1x32xf32>
    %118 = arith.mulf %113, %117 : vector<1x32xf32>
    %c6 = arith.constant 6 : index
    %c0_35 = arith.constant 0 : index
    %119 = vector.load %arg4[%c6, %c0_35] : memref<8x128xf32, #tpu.memory_space<vmem>>, vector<1x128xf32>
    %120 = arith.truncf %118 : vector<1x32xf32> to vector<1x32xbf16>
    %cst_36 = arith.constant dense<0.000000e+00> : vector<1x128xf32>
    %121 = tpu.matmul %120, %3, %cst_36 {dimension_numbers = #tpu.dot_dimension_numbers<[1], [0], [0], [1], [0, 0, 1, 1], [], []>} : vector<1x32xbf16>, vector<32x128xbf16>, vector<1x128xf32> -> vector<1x128xf32>
    %122 = arith.addf %119, %121 : vector<1x128xf32>
    %123 = math.tanh %122 : vector<1x128xf32>
    %cst_37 = arith.constant 5.000000e-01 : f32
    %124 = vector.broadcast %cst_37 : f32 to vector<1x128xf32>
    %125 = arith.mulf %124, %123 : vector<1x128xf32>
    %cst_38 = arith.constant 5.000000e-01 : f32
    %126 = vector.broadcast %cst_38 : f32 to vector<1x128xf32>
    %127 = arith.addf %125, %126 : vector<1x128xf32>
    %128 = vector.extract_strided_slice %127 {offsets = [0, 0], sizes = [1, 32], strides = [1, 1]} : vector<1x128xf32> to vector<1x32xf32>
    %129 = vector.extract_strided_slice %127 {offsets = [0, 32], sizes = [1, 32], strides = [1, 1]} : vector<1x128xf32> to vector<1x32xf32>
    %130 = vector.extract_strided_slice %123 {offsets = [0, 64], sizes = [1, 32], strides = [1, 1]} : vector<1x128xf32> to vector<1x32xf32>
    %131 = vector.extract_strided_slice %127 {offsets = [0, 96], sizes = [1, 32], strides = [1, 1]} : vector<1x128xf32> to vector<1x32xf32>
    %132 = arith.mulf %129, %116 : vector<1x32xf32>
    %133 = arith.mulf %128, %130 : vector<1x32xf32>
    %134 = arith.addf %132, %133 : vector<1x32xf32>
    %135 = math.tanh %134 : vector<1x32xf32>
    %136 = arith.mulf %131, %135 : vector<1x32xf32>
    %c7 = arith.constant 7 : index
    %c0_39 = arith.constant 0 : index
    %137 = vector.load %arg4[%c7, %c0_39] : memref<8x128xf32, #tpu.memory_space<vmem>>, vector<1x128xf32>
    %138 = arith.truncf %136 : vector<1x32xf32> to vector<1x32xbf16>
    %cst_40 = arith.constant dense<0.000000e+00> : vector<1x128xf32>
    %139 = tpu.matmul %138, %3, %cst_40 {dimension_numbers = #tpu.dot_dimension_numbers<[1], [0], [0], [1], [0, 0, 1, 1], [], []>} : vector<1x32xbf16>, vector<32x128xbf16>, vector<1x128xf32> -> vector<1x128xf32>
    %140 = arith.addf %137, %139 : vector<1x128xf32>
    %141 = math.tanh %140 : vector<1x128xf32>
    %cst_41 = arith.constant 5.000000e-01 : f32
    %142 = vector.broadcast %cst_41 : f32 to vector<1x128xf32>
    %143 = arith.mulf %142, %141 : vector<1x128xf32>
    %cst_42 = arith.constant 5.000000e-01 : f32
    %144 = vector.broadcast %cst_42 : f32 to vector<1x128xf32>
    %145 = arith.addf %143, %144 : vector<1x128xf32>
    %146 = vector.extract_strided_slice %145 {offsets = [0, 0], sizes = [1, 32], strides = [1, 1]} : vector<1x128xf32> to vector<1x32xf32>
    %147 = vector.extract_strided_slice %145 {offsets = [0, 32], sizes = [1, 32], strides = [1, 1]} : vector<1x128xf32> to vector<1x32xf32>
    %148 = vector.extract_strided_slice %141 {offsets = [0, 64], sizes = [1, 32], strides = [1, 1]} : vector<1x128xf32> to vector<1x32xf32>
    %149 = vector.extract_strided_slice %145 {offsets = [0, 96], sizes = [1, 32], strides = [1, 1]} : vector<1x128xf32> to vector<1x32xf32>
    %150 = arith.mulf %147, %134 : vector<1x32xf32>
    %151 = arith.mulf %146, %148 : vector<1x32xf32>
    %152 = arith.addf %150, %151 : vector<1x32xf32>
    %153 = math.tanh %152 : vector<1x32xf32>
    %154 = arith.mulf %149, %153 : vector<1x32xf32>
    %c48 = arith.constant 48 : index
    %c0_43 = arith.constant 0 : index
    %155 = vector.load %arg1[%c48, %c0_43] : memref<80x128xbf16, #tpu.memory_space<vmem>>, vector<32x128xbf16>
    %156 = arith.truncf %154 : vector<1x32xf32> to vector<1x32xbf16>
    %cst_44 = arith.constant dense<0.000000e+00> : vector<1x128xf32>
    %157 = tpu.matmul %156, %155, %cst_44 {dimension_numbers = #tpu.dot_dimension_numbers<[1], [0], [0], [1], [0, 0, 1, 1], [], []>} : vector<1x32xbf16>, vector<32x128xbf16>, vector<1x128xf32> -> vector<1x128xf32>
    %c1_45 = arith.constant 1 : index
    %c0_46 = arith.constant 0 : index
    %158 = vector.load %arg2[%c1_45, %c0_46] : memref<2x128xf32, #tpu.memory_space<vmem>>, vector<1x128xf32>
    %159 = arith.addf %157, %158 : vector<1x128xf32>
    %160 = vector.extract_strided_slice %159 {offsets = [0, 0], sizes = [1, 10], strides = [1, 1]} : vector<1x128xf32> to vector<1x10xf32>
    %c0_47 = arith.constant 0 : index
    %c0_48 = arith.constant 0 : index
    %161 = vector.load %arg3[%c0_47, %c0_48] : memref<1x10xf32, #tpu.memory_space<vmem>>, vector<1x10xf32>
    tpu.vector_store %arg3[%c0_47, %c0_48], %160 {strides = array<i32>} : memref<1x10xf32, #tpu.memory_space<vmem>>, vector<1x10xf32>,
    return
  }
}

</mosaic_0001>

<bundles_post_ra>
// kernel: lstm_forward.1
= control target key start
LH: loop header
LB: loop body
LE: loop exit
PB: predicated region body
PF: predicated region fallthrough
CT: control target
= control target key end

     0   :  { %8 = vsyncpa [#allocation4], 0  ;;  %s1171_s0 = inlined_call_operand.hbm [shape: f32[8,10], index: 0, kind: input, shape index: {}]   ;;  %s1172_s1 = inlined_call_operand.hbm [shape: bf16[80,128], index: 1, kind: input, shape index: {}]   ;;  %s1173_s2 = inlined_call_operand.vmem [shape: f32[2,128], index: 2, kind: input, shape index: {}]   ;;  %s1174_s3 = inlined_call_operand.hbm [shape: f32[1,10], index: 3, kind: output, shape index: {}]  }
   0x1   :  { %9 = vsyncpa [#allocation7], 0 }
   0x2   :  { %10 = vsyncpa [#allocation5], 0  ;;  %s992_s12 = smov [#allocation3]   ;;  %s993_s14 = smov [#allocation6]  }
   0x3   :  { %s17_s13 = sshll.u32 %s992_s12, 4  ;;  %s26_s15 = sshll.u32 %s993_s14, 4  ;;  %s18_s13 = int_to_ptr.vmem [resolvable:$true] %s17_s13  ;;  %s1021_s15 = int_to_ptr.vmem [resolvable:$true] %s26_s15 }
   0x4   :  { %s920_s18 = scalar_lea.hbm %s1171_s0, 128 }
   0x5   :  { %p921_p0 = scmp.ne.s32.totalorder %s1171_s0, %s920_s18  ;;  %p924_p1 = scmp.lt.u32.totalorder %s920_s18, %s1171_s0 }
   0x7   :  { %p926_p2 = pnand %p924_p1, %p921_p0 }
   0x9   :  { %929 = shalt.err (!%p926_p2)
}
   0xa   :  { %s930_s23 = scalar_lea.vmem %s18_s13, 128  ;;  %p935_p4 = scmp.lt.s32.totalorder %s18_s13, %s18_s13 }
   0xb   :  { %p931_p3 = scmp.ne.s32.totalorder %s18_s13, %s930_s23  ;;  %p936_p5 = scmp.lt.s32.totalorder %s930_s23, %s930_s23 }
   0xd   :  { %p937_p6 = por %p936_p5, %p935_p4 }
   0xf   :  { %p938_p7 = pnand %p937_p6, %p931_p3 }
  0x11   :  { %941 = shalt.err (!%p938_p7)
}
  0x12   :  { %20 = dma.hbm_to_vmem [thread:$0]  %s1171_s0, 128, %s18_s13, [#allocation4]  }
  0x13   :  { %s942_s28 = scalar_lea.hbm %s1172_s1, 640 }
  0x14   :  { %p943_p8 = scmp.ne.s32.totalorder %s1172_s1, %s942_s28  ;;  %p946_p9 = scmp.lt.u32.totalorder %s942_s28, %s1172_s1 }
  0x16   :  { %p948_p10 = pnand %p946_p9, %p943_p8 }
  0x18   :  { %951 = shalt.err (!%p948_p10)
}
  0x19   :  { %s952_s6 = scalar_lea.vmem %s1021_s15, 640  ;;  %p957_p12 = scmp.lt.s32.totalorder %s1021_s15, %s1021_s15 }
  0x1a   :  { %p953_p11 = scmp.ne.s32.totalorder %s1021_s15, %s952_s6  ;;  %p958_p13 = scmp.lt.s32.totalorder %s952_s6, %s952_s6 }
  0x1c   :  { %p959_p0 = por %p958_p13, %p957_p12 }
  0x1e   :  { %p960_p1 = pnand %p959_p0, %p953_p11 }
  0x20   :  { %963 = shalt.err (!%p960_p1)
}
  0x21   :  { %s994_s0 = smov 64   ;;  %s995_s7 = smov 4  }
  0x22   :  { %32 = dma.hbm_to_vmem [thread:$0]  %s1172_s1, 640, %s1021_s15, [#allocation7], %s994_s0, %s994_s0, %s995_s7  }
  0x23   :  { %986 = dma.done.wait [#allocation4], 128  }
  0x24   :  { %987 = vsyncadd [#allocation4], 4294967168 }
  0x25   :  { %988 = dma.done.wait [#allocation7], 640  }
  0x26   :  { %989 = vsyncadd [#allocation7], 4294966656  ;;  %v996_v0 = vmov 0.0   ;;  %vm997_vm0 = vmmov 0   ;;  %vm64_vm1 = vcmask 1044480   ;;  %v42_v2 = vld [vmem:[#allocation3] sm:$0xff] }
  0x27   :  { %796 = vmatprep.subr.bf16.mxu0 %v996_v0  ;;  %798 = vmatprep.mubr.msk.bf16.mxu0 %vm997_vm0, %v996_v0  ;;  %v883_v1 = vld [vmem:[#allocation6] sm:$0x1f]   ;;  %v43_v4 = vpack.c.bf16 %v42_v2, %v42_v2  ;;  %v1060_v5 = vld [vmem:[#allocation6 + $0x8] sm:$0xff]   ;;  %vm60_vm2 = vcmask 80896   ;;  %v1062_v6 = vld [vmem:[#allocation6 + $0x10] sm:$0xff]   ;;  %v998_v7 = vmov 0  }
  0x28   :  { %802 = vmatprep.subr.bf16.mxu1 %v996_v0  ;;  %806 = vmatprep.mubr.msk.bf16.mxu1 %vm997_vm0, %v996_v0  ;;  %v66_v3 = vsel %vm64_vm1, %v883_v1, 0  ;;  %v752_v8 = vld [vmem:[%s1173_s2] ss:$0 sm:$0xff]  ;;  %s999_s11 = smov 32   ;;  %vm122_vm3 = vcmask 261120   ;;  %s1000_s14 = smov [#allocation8]  }
  0x29   :  { %797 = vmatpush3.bf16.msra.mxu0 %v66_v3  ;;  %803 = vmatpush3.bf16.msra.mxu1 %v1060_v5  ;;  %s742_s15 = sshll.u32 %s1000_s14, 4  ;;  %vm734_vm4 = vcmask 73728   ;;  %s743_s15 = int_to_ptr.vmem [resolvable:$true] %s742_s15 }
  0x2a   :  { %810 = vmatprep.subr.bf16.mxu0 %v996_v0  ;;  %804 = vmatprep.subr.bf16.mxu1 %v996_v0  ;;  %s964_s16 = scalar_lea.vmem %s743_s15, 16  ;;  %s968_s17 = scalar_lea.vmem %s743_s15, 32 }
  0x2b   :  { %p965_p2 = scmp.ne.s32.totalorder %s743_s15, %s964_s16  ;;  %p969_p3 = scmp.lt.s32.totalorder %s743_s15, %s743_s15 }
  0x2c   :  { %799 = vmatmul.mubr.msk.bf16.vlgmr.msra.gmra.mrb[0].mxu0 %vm60_vm2, %v43_v4  ;;  %p970_p4 = scmp.lt.s32.totalorder %s968_s17, %s964_s16 }
  0x2d   :  { %811 = vmatpush3.bf16.msra.mxu0 %v1060_v5  ;;  %814 = vmatprep.mubr.msk.bf16.mxu0 %vm997_vm0, %v996_v0 }
  0x2e   :  { %805 = vmatpush3.bf16.msra.mxu1 %v1062_v6  ;;  %812 = vmatprep.subr.bf16.mxu0 %v996_v0  ;;  %p971_p5 = por %p970_p4, %p969_p3 }
  0x2f   :  { %818 = vmatprep.subr.bf16.mxu1 %v996_v0 }
  0x30   :  { %p972_p6 = pnand %p971_p5, %p965_p2 }
  0x31   :  { %807 = vmatmul.mubr.bf16.vlgmr.msra.gmra.mrb[0].mxu1 %v998_v7  ;;  %813 = vmatpush3.bf16.msra.mxu0 %v1062_v6 }
  0x32   :  { %819 = vmatpush3.bf16.msra.mxu1 %v1060_v5  ;;  %822 = vmatprep.mubr.msk.bf16.mxu1 %vm997_vm0, %v996_v0 }
  0x33   :  { %820 = vmatprep.subr.bf16.mxu1 %v996_v0  ;;  %826 = vmatprep.subr.bf16.mxu0 %v996_v0 }
  0x36   :  { %821 = vmatpush3.bf16.msra.mxu1 %v1062_v6 }
  0x37   :  { %834 = vmatprep.subr.bf16.mxu1 %v996_v0 }
  0xff   :  { %v102_v9 = vpop.f32.mrb[0].mxu0 }
 0x100   :  { %v103_v10 = vadd.f32 %v752_v8, %v102_v9  ;;  %v800_v11 = vpop.f32.mrb[1].mxu0 }
 0x101   :  { %v105_v12 = vpop.f32.mrb[2].mxu0 }
 0x102   :  { %108 = vst [vmem:[#allocation2] sm:$0xff] %v103_v10  ;;  %v801_v13 = vpop.f32.mrb[3].mxu0 }
 0x104   :  { %v160_v14 = vpop.f32.mrb[0].mxu1 }
 0x105   :  { %v808_v15 = vpop.f32.mrb[1].mxu1 }
 0x106   :  { %v163_v16 = vpop.f32.mrb[2].mxu1 }
 0x107   :  { %v809_v17 = vpop.f32.mrb[3].mxu1 }
 0x109   :  { %v109_v18 = vld [vmem:[#allocation2] sm:$0x1]  ;;  %v187_v33 = vld [vmem:[#allocation2 + $0x1] sm:$0x1]  ;;  %v256_v52 = vld [vmem:[#allocation2 + $0x2] sm:$0x1] }
 0x10a   :  { %v166_v19 = vadd.f32 %v160_v14, %v109_v18  ;;  %v325_v10 = vld [vmem:[#allocation2 + $0x3] sm:$0x1] }
 0x10c   :  { %888 = vtanh.f32 %v166_v19 }
 0x116   :  { %v889_v20 = vpop.eup %888 }
 0x117   :  { %172 = vrot.lane.b32.xlu0 %v889_v20, %s994_s0  ;;  %v168_v21 = vmul.f32 0.5, %v889_v20 }
 0x119   :  { %v169_v22 = vadd.f32 0.5, %v168_v21 }
 0x11b   :  { %v170_v25 = vmul.f32 0.0, %v169_v22 }
 0x189   :  { %v173_v23 = vpop.permute.xlu0 %172 }
 0x18a   :  { %v175_v24 = vmul.f32 %v173_v23, %v169_v22 }
 0x18c   :  { %177 = vrot.lane.b32.xlu0 %v175_v24, %s999_s11 }
 0x1fe   :  { %v178_v26 = vpop.permute.xlu0 %177 }
 0x1ff   :  { %v180_v27 = vadd.f32 %v178_v26, %v170_v25 }
 0x201   :  { %890 = vtanh.f32 %v180_v27 }
 0x20b   :  { %v891_v28 = vpop.eup %890 }
 0x20c   :  { %183 = vrot.lane.b32.xlu1 %v891_v28, %s994_s0 }
 0x27e   :  { %v184_v29 = vpop.permute.xlu1 %183 }
 0x27f   :  { %v186_v30 = vmul.f32 %v184_v29, %v169_v22  ;;  %v394_v29 = vld [vmem:[#allocation2 + $0x4] sm:$0x1] }
 0x281   :  { %v188_v31 = vpack.c.bf16 %v186_v30, %v186_v30 }
 0x283   :  { %190 = vrot.lane.b32.xlu1 %v188_v31, %s999_s11 }
 0x2f5   :  { %v191_v32 = vpop.permute.xlu1 %190 }
 0x2f6   :  { %815 = vmatmul.mubr.msk.bf16.vlgmr.msra.gmra.mrb[4].mxu0 %vm122_vm3, %v191_v32 }
 0x2f7   :  { %827 = vmatpush3.bf16.msra.mxu0 %v1060_v5  ;;  %830 = vmatprep.mubr.msk.bf16.mxu0 %vm997_vm0, %v996_v0 }
 0x2f8   :  { %828 = vmatprep.subr.bf16.mxu0 %v996_v0 }
 0x2fb   :  { %829 = vmatpush3.bf16.msra.mxu0 %v1062_v6 }
 0x2fc   :  { %842 = vmatprep.subr.bf16.mxu0 %v996_v0 }
 0x3c9   :  { %v229_v34 = vpop.f32.mrb[4].mxu0 }
 0x3ca   :  { %v235_v35 = vadd.f32 %v229_v34, %v187_v33  ;;  %v816_v36 = vpop.f32.mrb[5].mxu0 }
 0x3cb   :  { %v232_v37 = vpop.f32.mrb[6].mxu0 }
 0x3cc   :  { %892 = vtanh.f32 %v235_v35  ;;  %v817_v38 = vpop.f32.mrb[7].mxu0 }
 0x3d6   :  { %v893_v39 = vpop.eup %892 }
 0x3d7   :  { %241 = vrot.lane.b32.xlu0 %v893_v39, %s994_s0  ;;  %v237_v40 = vmul.f32 0.5, %v893_v39 }
 0x3d9   :  { %v238_v41 = vadd.f32 0.5, %v237_v40 }
 0x3db   :  { %v239_v44 = vmul.f32 %v238_v41, %v180_v27 }
 0x449   :  { %v242_v42 = vpop.permute.xlu0 %241 }
 0x44a   :  { %v244_v43 = vmul.f32 %v242_v42, %v238_v41 }
 0x44c   :  { %246 = vrot.lane.b32.xlu1 %v244_v43, %s999_s11 }
 0x4be   :  { %v247_v45 = vpop.permute.xlu1 %246 }
 0x4bf   :  { %v249_v46 = vadd.f32 %v247_v45, %v239_v44 }
 0x4c1   :  { %894 = vtanh.f32 %v249_v46 }
 0x4cb   :  { %v895_v47 = vpop.eup %894 }
 0x4cc   :  { %252 = vrot.lane.b32.xlu0 %v895_v47, %s994_s0 }
 0x53e   :  { %v253_v48 = vpop.permute.xlu0 %252 }
 0x53f   :  { %v255_v49 = vmul.f32 %v253_v48, %v238_v41  ;;  %v463_v48 = vld [vmem:[#allocation2 + $0x5] sm:$0x1] }
 0x541   :  { %v257_v50 = vpack.c.bf16 %v255_v49, %v255_v49 }
 0x543   :  { %259 = vrot.lane.b32.xlu1 %v257_v50, %s999_s11 }
 0x5b5   :  { %v260_v51 = vpop.permute.xlu1 %259 }
 0x5b6   :  { %823 = vmatmul.mubr.msk.bf16.vlgmr.msra.gmra.mrb[4].mxu1 %vm122_vm3, %v260_v51 }
 0x5b7   :  { %835 = vmatpush3.bf16.msra.mxu1 %v1060_v5  ;;  %838 = vmatprep.mubr.msk.bf16.mxu1 %vm997_vm0, %v996_v0 }
 0x5b8   :  { %836 = vmatprep.subr.bf16.mxu1 %v996_v0 }
 0x5bb   :  { %837 = vmatpush3.bf16.msra.mxu1 %v1062_v6 }
 0x5bc   :  { %850 = vmatprep.subr.bf16.mxu1 %v996_v0 }
 0x689   :  { %v298_v53 = vpop.f32.mrb[4].mxu1 }
 0x68a   :  { %v304_v54 = vadd.f32 %v298_v53, %v256_v52  ;;  %v824_v55 = vpop.f32.mrb[5].mxu1 }
 0x68b   :  { %v301_v56 = vpop.f32.mrb[6].mxu1 }
 0x68c   :  { %896 = vtanh.f32 %v304_v54  ;;  %v825_v57 = vpop.f32.mrb[7].mxu1 }
 0x696   :  { %v897_v58 = vpop.eup %896 }
 0x697   :  { %310 = vrot.lane.b32.xlu0 %v897_v58, %s994_s0  ;;  %v306_v59 = vmul.f32 0.5, %v897_v58 }
 0x699   :  { %v307_v60 = vadd.f32 0.5, %v306_v59 }
 0x69b   :  { %v308_v63 = vmul.f32 %v307_v60, %v249_v46 }
 0x709   :  { %v311_v61 = vpop.permute.xlu0 %310 }
 0x70a   :  { %v313_v62 = vmul.f32 %v311_v61, %v307_v60 }
 0x70c   :  { %315 = vrot.lane.b32.xlu1 %v313_v62, %s999_s11 }
 0x77e   :  { %v316_v1 = vpop.permute.xlu1 %315 }
 0x77f   :  { %v318_v2 = vadd.f32 %v316_v1, %v308_v63 }
 0x781   :  { %898 = vtanh.f32 %v318_v2 }
 0x78b   :  { %v899_v3 = vpop.eup %898 }
 0x78c   :  { %321 = vrot.lane.b32.xlu0 %v899_v3, %s994_s0 }
 0x7fe   :  { %v322_v4 = vpop.permute.xlu0 %321 }
 0x7ff   :  { %v324_v7 = vmul.f32 %v322_v4, %v307_v60 }
 0x801   :  { %v326_v8 = vpack.c.bf16 %v324_v7, %v324_v7 }
 0x803   :  { %328 = vrot.lane.b32.xlu1 %v326_v8, %s999_s11 }
 0x875   :  { %v329_v9 = vpop.permute.xlu1 %328 }
 0x876   :  { %831 = vmatmul.mubr.msk.bf16.vlgmr.msra.gmra.mrb[8].mxu0 %vm122_vm3, %v329_v9 }
 0x877   :  { %843 = vmatpush3.bf16.msra.mxu0 %v1060_v5  ;;  %846 = vmatprep.mubr.msk.bf16.mxu0 %vm997_vm0, %v996_v0 }
 0x878   :  { %844 = vmatprep.subr.bf16.mxu0 %v996_v0 }
 0x87b   :  { %845 = vmatpush3.bf16.msra.mxu0 %v1062_v6 }
 0x87c   :  { %858 = vmatprep.subr.bf16.mxu0 %v996_v0 }
 0x949   :  { %v367_v11 = vpop.f32.mrb[8].mxu0 }
 0x94a   :  { %v373_v12 = vadd.f32 %v367_v11, %v325_v10  ;;  %v832_v13 = vpop.f32.mrb[9].mxu0 }
 0x94b   :  { %v370_v14 = vpop.f32.mrb[10].mxu0 }
 0x94c   :  { %900 = vtanh.f32 %v373_v12  ;;  %v833_v15 = vpop.f32.mrb[11].mxu0 }
 0x956   :  { %v901_v16 = vpop.eup %900 }
 0x957   :  { %379 = vrot.lane.b32.xlu0 %v901_v16, %s994_s0  ;;  %v375_v17 = vmul.f32 0.5, %v901_v16 }
 0x959   :  { %v376_v18 = vadd.f32 0.5, %v375_v17 }
 0x95b   :  { %v377_v21 = vmul.f32 %v376_v18, %v318_v2  ;;  %v532_v2 = vld [vmem:[#allocation2 + $0x6] sm:$0x1] }
 0x9c9   :  { %v380_v19 = vpop.permute.xlu0 %379 }
 0x9ca   :  { %v382_v20 = vmul.f32 %v380_v19, %v376_v18 }
 0x9cc   :  { %384 = vrot.lane.b32.xlu1 %v382_v20, %s999_s11 }
 0xa3e   :  { %v385_v22 = vpop.permute.xlu1 %384 }
 0xa3f   :  { %v387_v23 = vadd.f32 %v385_v22, %v377_v21 }
 0xa41   :  { %902 = vtanh.f32 %v387_v23 }
 0xa4b   :  { %v903_v24 = vpop.eup %902 }
 0xa4c   :  { %390 = vrot.lane.b32.xlu0 %v903_v24, %s994_s0 }
 0xabe   :  { %v391_v25 = vpop.permute.xlu0 %390 }
 0xabf   :  { %v393_v26 = vmul.f32 %v391_v25, %v376_v18 }
 0xac1   :  { %v395_v27 = vpack.c.bf16 %v393_v26, %v393_v26 }
 0xac3   :  { %397 = vrot.lane.b32.xlu1 %v395_v27, %s999_s11 }
 0xb35   :  { %v398_v28 = vpop.permute.xlu1 %397 }
 0xb36   :  { %839 = vmatmul.mubr.msk.bf16.vlgmr.msra.gmra.mrb[8].mxu1 %vm122_vm3, %v398_v28 }
 0xb37   :  { %851 = vmatpush3.bf16.msra.mxu1 %v1060_v5  ;;  %854 = vmatprep.mubr.msk.bf16.mxu1 %vm997_vm0, %v996_v0 }
 0xb38   :  { %852 = vmatprep.subr.bf16.mxu1 %v996_v0 }
 0xb3b   :  { %853 = vmatpush3.bf16.msra.mxu1 %v1062_v6 }
 0xb3c   :  { %866 = vmatprep.subr.bf16.mxu1 %v996_v0 }
 0xc09   :  { %v436_v30 = vpop.f32.mrb[8].mxu1 }
 0xc0a   :  { %v442_v31 = vadd.f32 %v436_v30, %v394_v29  ;;  %v840_v32 = vpop.f32.mrb[9].mxu1 }
 0xc0b   :  { %v439_v33 = vpop.f32.mrb[10].mxu1 }
 0xc0c   :  { %904 = vtanh.f32 %v442_v31  ;;  %v841_v34 = vpop.f32.mrb[11].mxu1 }
 0xc16   :  { %v905_v35 = vpop.eup %904 }
 0xc17   :  { %448 = vrot.lane.b32.xlu0 %v905_v35, %s994_s0  ;;  %v444_v36 = vmul.f32 0.5, %v905_v35 }
 0xc19   :  { %v445_v37 = vadd.f32 0.5, %v444_v36 }
 0xc1b   :  { %v446_v40 = vmul.f32 %v445_v37, %v387_v23  ;;  %v601_v23 = vld [vmem:[#allocation2 + $0x7] sm:$0x1] }
 0xc89   :  { %v449_v38 = vpop.permute.xlu0 %448 }
 0xc8a   :  { %v451_v39 = vmul.f32 %v449_v38, %v445_v37  ;;  %v887_v38 = vld [vmem:[#allocation6 + $0x20] sm:$0xff]  }
 0xc8c   :  { %453 = vrot.lane.b32.xlu1 %v451_v39, %s999_s11 }
 0xcfe   :  { %v454_v41 = vpop.permute.xlu1 %453 }
 0xcff   :  { %v456_v42 = vadd.f32 %v454_v41, %v446_v40 }
 0xd01   :  { %906 = vtanh.f32 %v456_v42 }
 0xd0b   :  { %v907_v43 = vpop.eup %906 }
 0xd0c   :  { %459 = vrot.lane.b32.xlu0 %v907_v43, %s994_s0 }
 0xd7e   :  { %v460_v44 = vpop.permute.xlu0 %459 }
 0xd7f   :  { %v462_v45 = vmul.f32 %v460_v44, %v445_v37  ;;  %v886_v37 = vld [vmem:[#allocation6 + $0x18] sm:$0xff]   ;;  %v675_v44 = vld [vmem:[%s1173_s2 + $0x1] sm:$0x1] }
 0xd81   :  { %v464_v46 = vpack.c.bf16 %v462_v45, %v462_v45 }
 0xd83   :  { %466 = vrot.lane.b32.xlu1 %v464_v46, %s999_s11 }
 0xdf5   :  { %v467_v47 = vpop.permute.xlu1 %466 }
 0xdf6   :  { %847 = vmatmul.mubr.msk.bf16.vlgmr.msra.gmra.mrb[12].mxu0 %vm122_vm3, %v467_v47 }
 0xdf7   :  { %859 = vmatpush3.bf16.msra.mxu0 %v1060_v5  ;;  %862 = vmatprep.mubr.msk.bf16.mxu0 %vm997_vm0, %v996_v0 }
 0xdf8   :  { %860 = vmatprep.subr.bf16.mxu0 %v996_v0 }
 0xdfb   :  { %861 = vmatpush3.bf16.msra.mxu0 %v1062_v6 }
 0xec9   :  { %v505_v49 = vpop.f32.mrb[12].mxu0 }
 0xeca   :  { %v511_v50 = vadd.f32 %v505_v49, %v463_v48  ;;  %v848_v51 = vpop.f32.mrb[13].mxu0 }
 0xecb   :  { %v508_v52 = vpop.f32.mrb[14].mxu0 }
 0xecc   :  { %908 = vtanh.f32 %v511_v50  ;;  %v849_v53 = vpop.f32.mrb[15].mxu0 }
 0xed6   :  { %v909_v54 = vpop.eup %908 }
 0xed7   :  { %517 = vrot.lane.b32.xlu0 %v909_v54, %s994_s0  ;;  %v513_v55 = vmul.f32 0.5, %v909_v54 }
 0xed9   :  { %v514_v56 = vadd.f32 0.5, %v513_v55 }
 0xedb   :  { %v515_v58 = vmul.f32 %v514_v56, %v456_v42 }
 0xf49   :  { %v518_v5 = vpop.permute.xlu0 %517 }
 0xf4a   :  { %v520_v57 = vmul.f32 %v518_v5, %v514_v56 }
 0xf4c   :  { %522 = vrot.lane.b32.xlu1 %v520_v57, %s999_s11 }
 0xfbe   :  { %v523_v59 = vpop.permute.xlu1 %522 }
 0xfbf   :  { %v525_v60 = vadd.f32 %v523_v59, %v515_v58 }
 0xfc1   :  { %910 = vtanh.f32 %v525_v60 }
 0xfcb   :  { %v911_v6 = vpop.eup %910 }
 0xfcc   :  { %528 = vrot.lane.b32.xlu0 %v911_v6, %s994_s0 }
0x103e   :  { %v529_v61 = vpop.permute.xlu0 %528 }
0x103f   :  { %v531_v62 = vmul.f32 %v529_v61, %v514_v56 }
0x1041   :  { %v533_v63 = vpack.c.bf16 %v531_v62, %v531_v62 }
0x1043   :  { %535 = vrot.lane.b32.xlu1 %v533_v63, %s999_s11 }
0x10b5   :  { %v536_v1 = vpop.permute.xlu1 %535 }
0x10b6   :  { %855 = vmatmul.mubr.msk.bf16.vlgmr.msra.gmra.mrb[12].mxu1 %vm122_vm3, %v536_v1 }
0x10b7   :  { %870 = vmatprep.mubr.msk.bf16.mxu1 %vm997_vm0, %v996_v0  ;;  %867 = vmatpush3.bf16.msra.mxu1 %v886_v37 }
0x10b8   :  { %868 = vmatprep.subr.bf16.mxu1 %v996_v0 }
0x10bb   :  { %869 = vmatpush3.bf16.msra.mxu1 %v887_v38 }
0x1189   :  { %v574_v3 = vpop.f32.mrb[12].mxu1 }
0x118a   :  { %v580_v4 = vadd.f32 %v574_v3, %v532_v2  ;;  %v856_v7 = vpop.f32.mrb[13].mxu1 }
0x118b   :  { %v577_v8 = vpop.f32.mrb[14].mxu1 }
0x118c   :  { %912 = vtanh.f32 %v580_v4  ;;  %v857_v9 = vpop.f32.mrb[15].mxu1 }
0x1196   :  { %v913_v10 = vpop.eup %912 }
0x1197   :  { %586 = vrot.lane.b32.xlu0 %v913_v10, %s994_s0  ;;  %v582_v11 = vmul.f32 0.5, %v913_v10 }
0x1199   :  { %v583_v12 = vadd.f32 0.5, %v582_v11 }
0x119b   :  { %v584_v15 = vmul.f32 %v583_v12, %v525_v60 }
0x1209   :  { %v587_v13 = vpop.permute.xlu0 %586 }
0x120a   :  { %v589_v14 = vmul.f32 %v587_v13, %v583_v12 }
0x120c   :  { %591 = vrot.lane.b32.xlu1 %v589_v14, %s999_s11 }
0x127e   :  { %v592_v16 = vpop.permute.xlu1 %591 }
0x127f   :  { %v594_v17 = vadd.f32 %v592_v16, %v584_v15 }
0x1281   :  { %914 = vtanh.f32 %v594_v17 }
0x128b   :  { %v915_v18 = vpop.eup %914 }
0x128c   :  { %597 = vrot.lane.b32.xlu0 %v915_v18, %s994_s0 }
0x12fe   :  { %v598_v19 = vpop.permute.xlu0 %597 }
0x12ff   :  { %v600_v20 = vmul.f32 %v598_v19, %v583_v12 }
0x1301   :  { %v602_v21 = vpack.c.bf16 %v600_v20, %v600_v20 }
0x1303   :  { %604 = vrot.lane.b32.xlu1 %v602_v21, %s999_s11 }
0x1375   :  { %v605_v22 = vpop.permute.xlu1 %604 }
0x1376   :  { %863 = vmatmul.mubr.msk.bf16.vlgmr.msra.gmra.mrb[16].mxu0 %vm122_vm3, %v605_v22 }
0x1449   :  { %v643_v24 = vpop.f32.mrb[16].mxu0 }
0x144a   :  { %v649_v25 = vadd.f32 %v643_v24, %v601_v23  ;;  %v864_v26 = vpop.f32.mrb[17].mxu0 }
0x144b   :  { %v646_v27 = vpop.f32.mrb[18].mxu0 }
0x144c   :  { %916 = vtanh.f32 %v649_v25  ;;  %v865_v28 = vpop.f32.mrb[19].mxu0 }
0x1456   :  { %v917_v29 = vpop.eup %916 }
0x1457   :  { %655 = vrot.lane.b32.xlu0 %v917_v29, %s994_s0  ;;  %v651_v30 = vmul.f32 0.5, %v917_v29 }
0x1459   :  { %v652_v31 = vadd.f32 0.5, %v651_v30 }
0x145b   :  { %v653_v34 = vmul.f32 %v652_v31, %v594_v17 }
0x14c9   :  { %v656_v32 = vpop.permute.xlu0 %655 }
0x14ca   :  { %v658_v33 = vmul.f32 %v656_v32, %v652_v31 }
0x14cc   :  { %660 = vrot.lane.b32.xlu1 %v658_v33, %s999_s11 }
0x153e   :  { %v661_v35 = vpop.permute.xlu1 %660 }
0x153f   :  { %v663_v36 = vadd.f32 %v661_v35, %v653_v34 }
0x1541   :  { %918 = vtanh.f32 %v663_v36 }
0x154b   :  { %v919_v39 = vpop.eup %918 }
0x154c   :  { %666 = vrot.lane.b32.xlu0 %v919_v39, %s994_s0 }
0x15be   :  { %v667_v40 = vpop.permute.xlu0 %666 }
0x15bf   :  { %v669_v41 = vmul.f32 %v667_v40, %v652_v31 }
0x15c1   :  { %v674_v42 = vpack.c.bf16 %v669_v41, %v669_v41 }
0x15c3   :  { %677 = vrot.lane.b32.xlu1 %v674_v42, %s999_s11 }
0x1635   :  { %v678_v43 = vpop.permute.xlu1 %677 }
0x1636   :  { %871 = vmatmul.mubr.msk.bf16.vlgmr.msra.gmra.mrb[16].mxu1 %vm122_vm3, %v678_v43 }
0x1709   :  { %v728_v45 = vpop.f32.mrb[16].mxu1 }
0x170a   :  { %v729_v0 = vadd.f32 %v728_v45, %v675_v44  ;;  %v872_v46 = vpop.f32.mrb[17].mxu1 }
0x170b   :  { %v731_v47 = vpop.f32.mrb[18].mxu1 }
0x170c   :  { %v873_v48 = vpop.f32.mrb[19].mxu1  ;;  %735 = vst.msk [vmem:[#allocation8] sm:$0x1] %vm734_vm4, %v729_v0 }
0x170d   :  { %975 = shalt.err (!%p972_p6)
}
0x170e   :  { %s976_s19 = scalar_lea.hbm %s1174_s3, 16 }
0x170f   :  { %p977_p7 = scmp.ne.s32.totalorder %s1174_s3, %s976_s19  ;;  %p980_p8 = scmp.lt.u32.totalorder %s976_s19, %s1174_s3 }
0x1711   :  { %p982_p9 = pnand %p980_p8, %p977_p7 }
0x1713   :  { %985 = shalt.err (!%p982_p9)
}
0x1714   :  { %745 = dma.vmem_to_hbm [thread:$0]  %s743_s15, 16, %s1174_s3, [#allocation5]  }
0x1715   :  { %990 = dma.done.wait [#allocation5], 16  }
0x1716   :  { %991 = vsyncadd [#allocation5], 4294967280 }
0x1717   :  { %749 = vsyncpa [#allocation4], 1 }
0x1718   :  { %750 = vsyncpa [#allocation7], 1 }
0x1719   :  { %751 = vsyncpa [#allocation5], 1 }

</bundles_post_ra>
